<compile_context>
chip_gen: v6e
topology: v6e:2x2x1
jax: 0.10.0
libtpu: 0.0.40
codegen_flags: <defaults>
</compile_context>

<pallas_src>
import jax
import jax.numpy as jnp
from jax.experimental import pallas as pl
from jax.experimental.pallas import tpu as pltpu


def _round_up(x, m):
    return ((x + m - 1) // m) * m


def patch_embed_kernel(t_ref, w_ref, a_ref, o_ref):
    # t_ref: (TN, Kp) bf16 patch-pixel rows (token 0 of each batch is zeros -> cls slot)
    # w_ref: (Kp, E)  bf16 flattened conv weight (zero-padded along K)
    # a_ref: (TN, E)  f32 fused additive term (positions + conv bias; cls+pos on row 0)
    # o_ref: (TN, E)  output tile; rows past Ntok are masked on store by Pallas.
    acc = jnp.dot(t_ref[...], w_ref[...], preferred_element_type=jnp.float32)
    o_ref[...] = (acc + a_ref[...]).astype(o_ref.dtype)


def patch_embedding(x, conv_w, conv_b, cls_token, positions, patch_size,
                    *, target_tn=256, out_dtype=None):
    """Forward pass matching the PyTorch PatchEmbedding module.

    x         : (B, C, H, W)   NCHW
    conv_w    : (E, C, p, p)   Conv2d weight
    conv_b    : (E,)           Conv2d bias
    cls_token : (1, 1, E)
    positions : (Np + 1, E)
    returns   : (B, Np + 1, E) in out_dtype (default: x.dtype)
    """
    B, C, H, W = x.shape
    p = patch_size
    E = conv_w.shape[0]
    K = C * p * p
    Np = (H // p) * (W // p)
    Ntok = Np + 1
    out_dtype = x.dtype if out_dtype is None else out_dtype

    # Lane-align the pixel axis (e.g. C=3, p=14 -> K=588 -> 640) so token/weight
    # DMAs are unmasked and vregs dense; zero pad columns dot to 0.
    Kp = _round_up(K, 128) if K % 128 else K

    # Balanced, 16-aligned (bf16 sublane) token tiles, rounded UP — no nearly-empty
    # edge tile.  With B == 1, force >= 2 tiles so v7x's two TensorCores both work.
    n_tiles = max(pl.cdiv(Ntok, target_tn), 2 if (B == 1 and Ntok >= 32) else 1)
    TN = _round_up(pl.cdiv(Ntok, n_tiles), 16)
    n_tiles = pl.cdiv(Ntok, TN)
    Ntok_pad = n_tiles * TN

    # --- glue (XLA prelude): cast to bf16 FIRST so the im2col transpose + pads move
    # half the bytes; K ordering (C, ph, pw) matches the Conv2d weight flattening.
    xb = x.astype(jnp.bfloat16)
    patches = (
        xb.reshape(B, C, H // p, p, W // p, p)
        .transpose(0, 2, 4, 1, 3, 5)
        .reshape(B, Np, K)
    )
    # One zero pixel-row in front (token 0 = cls slot, 0 @ W == 0), zero rows at the
    # end up to Ntok_pad (all kernel READS in-bounds), zero K-padding lanes.
    tokens = jnp.pad(patches, ((0, 0), (1, Ntok_pad - Ntok), (0, Kp - K)))

    w2 = jnp.pad(conv_w.reshape(E, K).T.astype(jnp.bfloat16),
                 ((0, Kp - K), (0, 0)))                                  # (Kp, E)

    # Fused per-token additive (kept f32 for the positions add accuracy):
    # row 0 = cls + pos[0]; rows 1..Np = pos[1:] + conv bias; padded rows = 0.
    addv = jnp.concatenate(
        [
            (cls_token.reshape(1, E) + positions[0:1]).astype(jnp.float32),
            (positions[1:] + conv_b[None, :]).astype(jnp.float32),
            jnp.zeros((Ntok_pad - Ntok, E), jnp.float32),
        ],
        axis=0,
    )  # (Ntok_pad, E)

    # VMEM budget (double-buffered streams + weight), with headroom; capped at v7x's
    # 64 MiB physical, floored at the 32 MiB default so we never shrink the window.
    out_bytes = jnp.dtype(out_dtype).itemsize
    vmem_est = 2 * (TN * Kp * 2 + TN * E * 4 + TN * E * out_bytes + Kp * E * 2)
    vmem_limit = int(min(64 * 2**20, max(2 * vmem_est, 32 * 2**20)))

    # Grid: token tiles outer, batch INNER -> weight & addv block indices are constant
    # over the inner axis, so Pallas keeps them resident (no re-DMA) across batches.
    return pl.pallas_call(
        patch_embed_kernel,
        out_shape=jax.ShapeDtypeStruct((B, Ntok, E), out_dtype),
        grid_spec=pltpu.PrefetchScalarGridSpec(
            num_scalar_prefetch=0,
            grid=(n_tiles, B),
            in_specs=[
                pl.BlockSpec((None, TN, Kp), lambda j, b: (b, j, 0)),  # tokens
                pl.BlockSpec((Kp, E), lambda j, b: (0, 0)),            # weight (resident)
                pl.BlockSpec((TN, E), lambda j, b: (j, 0)),            # additive (resident over b)
            ],
            out_specs=pl.BlockSpec((None, TN, E), lambda j, b: (b, j, 0)),
        ),
        compiler_params=pltpu.CompilerParams(
            dimension_semantics=("parallel", "parallel"),
            vmem_limit_bytes=vmem_limit,
        ),
    )(tokens, w2, addv)


if __name__ == "__main__":
    # Small shapes consistent with the module: B=2, C=4, img=16, patch=4, E=128
    # (E a multiple of 128 lanes so the output tile is lane-dense).
    B, C, IMG, P, E = 2, 4, 16, 4, 128
    Np = (IMG // P) ** 2

    key = jax.random.PRNGKey(0)
    k1, k2, k3, k4, k5 = jax.random.split(key, 5)
    x = jax.random.normal(k1, (B, C, IMG, IMG), jnp.float32)
    conv_w = jax.random.normal(k2, (E, C, P, P), jnp.float32) * 0.02
    conv_b = jax.random.normal(k3, (E,), jnp.float32) * 0.02
    cls_token = jax.random.normal(k4, (1, 1, E), jnp.float32)
    positions = jax.random.normal(k5, (Np + 1, E), jnp.float32)

    out = patch_embedding(x, conv_w, conv_b, cls_token, positions, P)
    out = jax.block_until_ready(out)

    # Pure-JAX reference (same math as the PyTorch module; matmul operands cast
    # to bf16 to match the kernel's MXU precision, accumulation in f32).
    patches = (
        x.reshape(B, C, IMG // P, P, IMG // P, P)
        .transpose(0, 2, 4, 1, 3, 5)
        .reshape(B, Np, C * P * P)
    )
    proj = (
        jnp.einsum(
            "bnk,ek->bne",
            patches.astype(jnp.bfloat16),
            conv_w.reshape(E, -1).astype(jnp.bfloat16),
            preferred_element_type=jnp.float32,
        )
        + conv_b
    )
    ref = (
        jnp.concatenate([jnp.broadcast_to(cls_token, (B, 1, E)), proj], axis=1)
        + positions
    ).astype(x.dtype)

    assert out.shape == (B, Np + 1, E), out.shape
    assert jnp.allclose(out, ref, atol=1e-3, rtol=1e-3)
    print("KERNEL_OK")
</pallas_src>

<mosaic_0001>
module attributes {stable_mosaic.version = 11 : i64} {
  func.func @patch_embed_kernel(%arg0: i32, %arg1: i32, %arg2: memref<1x32x128xbf16, #tpu.memory_space<vmem>>, %arg3: memref<128x128xbf16, #tpu.memory_space<vmem>>, %arg4: memref<32x128xf32, #tpu.memory_space<vmem>>, %arg5: memref<1x32x128xf32, #tpu.memory_space<vmem>>) attributes {dimension_semantics = [#tpu.dimension_semantics<parallel>, #tpu.dimension_semantics<parallel>], iteration_bounds = array<i64: 1, 2>, scalar_prefetch = 0 : i64, scratch_operands = 0 : i64, tpu.core_type = #tpu.core_type<tc>, window_params = [{transform_indices = @transform_0, window_bounds = array<i64: 1, 32, 128>}, {pipeline_mode = #tpu.pipeline_mode<synchronous>, transform_indices = @transform_1, window_bounds = array<i64: 128, 128>}, {transform_indices = @transform_2, window_bounds = array<i64: 32, 128>}, {transform_indices = @transform_3, window_bounds = array<i64: 1, 32, 128>}]} {
    %c0 = arith.constant 0 : index
    %c0_0 = arith.constant 0 : index
    %c0_1 = arith.constant 0 : index
    %0 = vector.load %arg2[%c0, %c0_0, %c0_1] : memref<1x32x128xbf16, #tpu.memory_space<vmem>>, vector<1x32x128xbf16>
    %1 = vector.shape_cast %0 : vector<1x32x128xbf16> to vector<32x128xbf16>
    %c0_2 = arith.constant 0 : index
    %c0_3 = arith.constant 0 : index
    %2 = vector.load %arg3[%c0_2, %c0_3] : memref<128x128xbf16, #tpu.memory_space<vmem>>, vector<128x128xbf16>
    %cst = arith.constant dense<0.000000e+00> : vector<32x128xf32>
    %3 = tpu.matmul %1, %2, %cst {dimension_numbers = #tpu.dot_dimension_numbers<[1], [0], [0], [1], [0, 0, 1, 1], [], []>} : vector<32x128xbf16>, vector<128x128xbf16>, vector<32x128xf32> -> vector<32x128xf32>
    %c0_4 = arith.constant 0 : index
    %c0_5 = arith.constant 0 : index
    %4 = vector.load %arg4[%c0_4, %c0_5] : memref<32x128xf32, #tpu.memory_space<vmem>>, vector<32x128xf32>
    %5 = arith.addf %3, %4 : vector<32x128xf32>
    %c0_6 = arith.constant 0 : index
    %c0_7 = arith.constant 0 : index
    %c0_8 = arith.constant 0 : index
    %6 = vector.load %arg5[%c0_6, %c0_7, %c0_8] : memref<1x32x128xf32, #tpu.memory_space<vmem>>, vector<1x32x128xf32>
    %7 = vector.shape_cast %6 : vector<1x32x128xf32> to vector<32x128xf32>
    %8 = vector.shape_cast %5 : vector<32x128xf32> to vector<1x32x128xf32>
    tpu.vector_store %arg5[%c0_6, %c0_7, %c0_8], %8 {strides = array<i32>} : memref<1x32x128xf32, #tpu.memory_space<vmem>>, vector<1x32x128xf32>,
    return
  }
  func.func @transform_0(%arg0: i32, %arg1: i32) -> (i32, i32, i32) {
    %c0_i32 = arith.constant 0 : i32
    %c0_i32_0 = arith.constant 0 : i32
    return %arg1, %arg0, %c0_i32 : i32, i32, i32
  }
  func.func @transform_1(%arg0: i32, %arg1: i32) -> (i32, i32) {
    %c0_i32 = arith.constant 0 : i32
    %c0_i32_0 = arith.constant 0 : i32
    %c0_i32_1 = arith.constant 0 : i32
    return %c0_i32, %c0_i32_0 : i32, i32
  }
  func.func @transform_2(%arg0: i32, %arg1: i32) -> (i32, i32) {
    %c0_i32 = arith.constant 0 : i32
    %c0_i32_0 = arith.constant 0 : i32
    return %arg0, %c0_i32 : i32, i32
  }
  func.func @transform_3(%arg0: i32, %arg1: i32) -> (i32, i32, i32) {
    %c0_i32 = arith.constant 0 : i32
    %c0_i32_0 = arith.constant 0 : i32
    return %arg1, %arg0, %c0_i32 : i32, i32, i32
  }
}

</mosaic_0001>

<bundles_post_ra>
// kernel: tpu_custom_call.1
= control target key start
LH: loop header
LB: loop body
LE: loop exit
PB: predicated region body
PF: predicated region fallthrough
CT: control target
= control target key end

     0   :  { %8 = vsyncpa [#allocation3], 0  ;;  %s1182_s0 = inlined_call_operand.hbm [shape: bf16[2,32,128], index: 0, kind: input, shape index: {}]   ;;  %s1183_s1 = inlined_call_operand.hbm [shape: bf16[128,128], index: 1, kind: input, shape index: {}]   ;;  %s1184_s2 = inlined_call_operand.hbm [shape: f32[32,128], index: 2, kind: input, shape index: {}]   ;;  %s1185_s3 = inlined_call_operand.vmem [shape: f32[2,17,128], index: 3, kind: output, shape index: {}]  }
   0x1   :  { %10 = vsyncpa [#allocation3 + $0x1], 0 }
   0x2   :  { %11 = vsyncpa [#allocation5], 0  ;;  %s1026_s12 = smov 0   ;;  %s1028_s13 = smov 0  }
   0x3   :  { %s1030_s14 = smov 0   ;;  %s1032_s15 = smov 0  }
   0x4   :  { %s1034_s16 = smov 0   ;;  %s1036_s17 = smov 0  }
   0x5 LB: > { %s655_s18 = sadd.s32 4294967295, %s993_s17   ;;  %p51_p0 = scmp.ne.s32.totalorder %s977_s13, %s973_s12  ;;  %s993_s17 = sphi %s1036_s17, %s17_s17   ;;  %s989_s16 = sphi %s1034_s16, %s1199_s16   ;;  %s985_s15 = sphi %s1032_s15, %s1198_s15   ;;  %s981_s14 = sphi %s1030_s14, %s1197_s14   ;;  %s977_s13 = sphi %s1028_s13, %s1196_s13   ;;  %s973_s12 = sphi %s1026_s12, %s1195_s12  }
   0x6   : > { %p1056_p1 = scmp.eq.s32.totalorder %s655_s18, 0  ;;  %p1060_p2 = scmp.eq.s32.totalorder %s655_s18, 1 }
   0x7   : > { %p657_p3 = scmp.ge.s32.totalorder %s993_s17, 1  ;;  %p137_p4 = scmp.lt.s32.totalorder %s993_s17, 3 }
   0x8   : > { %p1068_p5 = por %p1056_p1, %p51_p0  ;;  %s999_s23 = smov [#allocation4]  }
   0x9   : > { %p1072_p6 = pnand %p657_p3, %p137_p4  ;;  %s149_s24 = sshll.u32 %s999_s23, 4  ;;  %s150_s24 = int_to_ptr.vmem [resolvable:$true] %s149_s24 }
   0xa   : > { %s1000_s26 = smov [#allocation6]   ;;  %s854_s28 = scalar_lea.vmem %s150_s24, 1024 }
   0xb   : > { %p731_p7 = pneg %p1072_p6  ;;  %s165_s27 = sshll.u32 %s1000_s26, 4  ;;  %s166_s27 = int_to_ptr.vmem [resolvable:$true] %s165_s27 }
   0xc   : > { %p855_p10 = scmp.ne.s32.totalorder %s150_s24, %s854_s28  ;;  %p862_p13 = scmp.lt.s32.totalorder %s150_s24, %s150_s24 }
   0xd   : > { %p1080_p8 = pnand %p731_p7, %p1056_p1  ;;  %p863_p0 = scmp.lt.s32.totalorder %s854_s28, %s854_s28 }
   0xf   : > { %p845_p9 = pneg %p1080_p8  ;;  %p864_p3 = por %p863_p0, %p862_p13 }
  0x11   : > { %p857_p11 = pnand %p855_p10, %p845_p9 }
  0x13   : > { %p858_p12 = pneg %p857_p11 }
  0x15   : > { %p865_p4 = pnand %p864_p3, %p858_p12 }
  0x17   : > { %868 = shalt.err (!%p865_p4)
}
  0x18   : > { %s1001_s29 = smov 64   ;;  %s1002_s30 = smov 4  }
  0x19   : > { %734 = dma.hbm_to_vmem [thread:$0]  (!%p1080_p8), %s1183_s1, 1024, %s150_s24, [#allocation5], %s1001_s29, %s1001_s29, %s1002_s30  }
  0x1a   : > { %s880_s6 = scalar_lea.vmem %s166_s27, 512  ;;  %p888_p12 = scmp.lt.s32.totalorder %s166_s27, %s166_s27 }
  0x1b   : > { %p881_p7 = scmp.ne.s32.totalorder %s166_s27, %s880_s6  ;;  %p889_p13 = scmp.lt.s32.totalorder %s880_s6, %s880_s6 }
  0x1d   : > { %p883_p10 = pnand %p881_p7, %p845_p9  ;;  %p890_p0 = por %p889_p13, %p888_p12 }
  0x1f   : > { %p884_p11 = pneg %p883_p10 }
  0x21   : > { %p891_p3 = pnand %p890_p0, %p884_p11 }
  0x23   : > { %894 = shalt.err (!%p891_p3)
}
  0x24   : > { %s1003_s7 = smov 128   ;;  %s1004_s8 = smov 8  }
  0x25   : > { %737 = dma.hbm_to_vmem [thread:$0]  (!%p1080_p8), %s1184_s2, 512, %s166_s27, [#allocation5], %s1003_s7, %s1003_s7, %s1004_s8  }
  0x26   : > { %s38_s11 = sadd.s32 1, %s981_s14  ;;  %s26_s12 = sadd.s32 1, %s989_s16 }
  0x27   : > { %p45_p9 = scmp.ne.s32.totalorder %s981_s14, %s977_s13  ;;  %p27_p4 = scmp.ge.s32.totalorder %s26_s12, 2 }
  0x28   : > { %p46_p7 = scmp.eq.s32.totalorder %s993_s17, 0  ;;  %p744_p11 = scmp.lt.s32.totalorder %s993_s17, 2 }
  0x29   : > { %p1112_p10 = por %p1060_p2, %p45_p9  ;;  %s1201_s12 = smov (%p27_p4, %s26_s12), 0 }
  0x2a   : > { %p47_p12 = por %p46_p7, %p45_p9  ;;  %s179_s23 = sand.u32 1, %s981_s14  }
  0x2b   : > { %s1191_s18 = scalar_select %p1112_p10, 1, 0 }
  0x2c   : > { %s33_s24 = ssub.s32 %s989_s16, %s1201_s12  ;;  %s661_s25 = sshll.u32 %s179_s23, 4 }
  0x2d   : > { %p36_p13 = scmp.eq.s32.totalorder %s33_s24, 0  ;;  %s689_s26 = sshll.u32 %s989_s16, 8 }
  0x2e   : > { %s191_s20 = scalar_lea.hbm %s1182_s0, %s689_s26  ;;  %s183_s5 = scalar_lea.vmem [#allocation2], %s661_s25 }
  0x2f   : > { %s1124_s27 = scalar_select %p36_p13, %s981_s14, %s38_s11  }
  0x30   : > { %s192_s6 = sshll.u32 %s183_s5, 4  ;;  %p1131_p2 = pnand %p744_p11, %p47_p12  ;;  %s193_s6 = int_to_ptr.vmem [resolvable:$true] %s192_s6 }
  0x31   : > { %s180_s8 = scalar_lea.sflag [#allocation3], %s179_s23  ;;  %s908_s9 = scalar_lea.vmem %s193_s6, 256 }
  0x32   : > { %p897_p8 = pneg %p1131_p2  ;;  %p909_p0 = scmp.ne.s32.totalorder %s193_s6, %s908_s9 }
  0x33   : > { %s1005_s10 = smov [#allocation2]  }
  0x34   : > { %p911_p3 = pnand %p909_p0, %p897_p8  ;;  %s913_s11 = sshll.u32 %s1005_s10, 4  ;;  %s914_s11 = int_to_ptr.vmem [resolvable:$false] %s913_s11 }
  0x35   : > { %s915_s24 = scalar_lea.vmem %s914_s11, 512  ;;  %p916_p4 = scmp.lt.s32.totalorder %s193_s6, %s914_s11 }
  0x36   : > { %p912_p9 = pneg %p911_p3  ;;  %p917_p7 = scmp.lt.s32.totalorder %s915_s24, %s908_s9 }
  0x38   : > { %p918_p13 = por %p917_p7, %p916_p4 }
  0x3a   : > { %p919_p10 = pnand %p918_p13, %p912_p9 }
  0x3c   : > { %922 = shalt.err (!%p919_p10)
}
  0x3d   : > { %741 = dma.hbm_to_vmem [thread:$0]  (!%p1131_p2), %s191_s20, 256, %s193_s6, %s180_s8, %s1001_s29, %s1001_s29, %s1002_s30  }
  0x3e   : > { %204 = sbr.rel (%p1072_p6) target bundleno = 313 (0x139), region = 32  ;;  %s1145_s23 = sand.u32 (!%p1072_p6), 1, %s977_s13  }
  0x3f   : > { %s665_s25 = sshll.u32 (!%p1072_p6), %s1145_s23, 4  ;;  %s207_s26 = scalar_lea.sflag (!%p1072_p6), [#allocation3], %s1145_s23 }
  0x40   : > { %s210_s28 = scalar_lea.vmem (!%p1072_p6), [#allocation2], %s665_s25 }
  0x43   : > { %964 = dma.done.wait (%p1068_p5), %s207_s26, 256  }
  0x44   : > { %966 = vsyncadd (%p1068_p5), %s207_s26, 4294967040 }
  0x45   : > { %968 = dma.done.wait (%p1056_p1), [#allocation5], 1536  }
  0x46   : > { %970 = vsyncadd (%p1056_p1), [#allocation5], 4294965760  ;;  %v833_v0 = vld [vmem:[#allocation4 + $0x38] sm:$0xff]   ;;  %v834_v1 = vld [vmem:[#allocation4 + $0x30] sm:$0xff]   ;;  %s668_s19 = sshll.u32 %s1145_s23, 5  ;;  %p1193_p1 = scmp.ne.s32.totalorder %s1191_s18, 0 }
  0x47   : > { %700 = vmatprep.subr.bf16.mxu0 %v833_v0  ;;  %v835_v2 = vld [vmem:[#allocation4 + $0x28] sm:$0xff]   ;;  %v836_v3 = vld [vmem:[#allocation4 + $0x20] sm:$0xff]   ;;  %v837_v5 = vld [vmem:[#allocation4 + $0x18] sm:$0xff]   ;;  %s239_s21 = scalar_lea.vmem [#allocation7], %s668_s19   ;;  %s720_s22 = smul.u32 (%p1193_p1), 24, %s985_s15 }
  0x48   : > { %701 = vmatpush3.bf16.msra.mxu0 %v833_v0  ;;  %v841_v4 = vld [vmem:[%s210_s28] sm:$0xff]   ;;  %v839_v7 = vld [vmem:[#allocation4 + $0x8] sm:$0xff]   ;;  %s995_s20 = smov (%p1193_p1), 0  }
  0x49   : > { %702 = vmatprep.subr.bf16.mxu0 %v834_v1  ;;  %716 = vmatprep.mubr.bf16.mxu0 %v841_v4  ;;  %v838_v6 = vld [vmem:[#allocation4 + $0x10] sm:$0xff]   ;;  %v840_v8 = vld [vmem:[#allocation4] sm:$0xff]   ;;  %v842_v9 = vld [vmem:[%s210_s28 + $0x8] sm:$0xff]   ;;  %s397_s4 = scalar_lea.vmem (%p1193_p1), %s1185_s3, %s720_s22  }
  0x4a   : > { %v268_v10 = vld [vmem:[#allocation6 + $0x10] sm:$0xff]  ;;  %v266_v12 = vld [vmem:[#allocation6] sm:$0xff]  ;;  %v267_v17 = vld [vmem:[#allocation6 + $0x8] sm:$0xff] }
  0x4c   : > { %703 = vmatpush3.bf16.msra.mxu0 %v834_v1 }
  0x4d   : > { %704 = vmatprep.subr.bf16.mxu0 %v835_v2 }
  0x50   : > { %705 = vmatpush3.bf16.msra.mxu0 %v835_v2 }
  0x51   : > { %706 = vmatprep.subr.bf16.mxu0 %v836_v3 }
  0x54   : > { %707 = vmatpush3.bf16.msra.mxu0 %v836_v3 }
  0x55   : > { %708 = vmatprep.subr.bf16.mxu0 %v837_v5 }
  0x58   : > { %709 = vmatpush3.bf16.msra.mxu0 %v837_v5 }
  0x59   : > { %710 = vmatprep.subr.bf16.mxu0 %v838_v6 }
  0x5c   : > { %711 = vmatpush3.bf16.msra.mxu0 %v838_v6 }
  0x5d   : > { %712 = vmatprep.subr.bf16.mxu0 %v839_v7 }
  0x60   : > { %713 = vmatpush3.bf16.msra.mxu0 %v839_v7 }
  0x61   : > { %714 = vmatprep.subr.bf16.mxu0 %v840_v8 }
  0x64   : > { %715 = vmatpush3.bf16.msra.mxu0 %v840_v8 }
  0x67   : > { %717 = vmatmul.mubr.bf16.vlgmr.msra.gmra.mxu0 %v842_v9 }
 0x127   : > { %v718_v11 = vpop.f32.mrf.mxu0 }
 0x128   : > { %v373_v13 = vadd.f32 %v718_v11, %v268_v10 }
 0x129   : > { %v364_v14 = vpop.f32.mrf.mxu0 }
 0x12a   : > { %381 = vst [vmem:[%s239_s21 + $0x10] sm:$0xff] %v373_v13  ;;  %v365_v15 = vadd.f32 %v364_v14, %v266_v12 }
 0x12b   : > { %v719_v16 = vpop.f32.mrf.mxu0 }
 0x12c   : > { %379 = vst [vmem:[%s239_s21] sm:$0xff] %v365_v15  ;;  %389 = sbr.rel (!%p1193_p1) target bundleno = 313 (0x139), region = 48 }
 0x12d   : > { %v367_v18 = vpop.f32.mrf.mxu0 }
 0x12e   : > { %v368_v19 = vadd.f32 %v367_v18, %v267_v17 }
 0x130   : > { %380 = vst [vmem:[%s239_s21 + $0x8] sm:$0xff] %v368_v19 }
 0x131 LB: >> { %v473_v22 = vld [vmem:[%s239_s21 + $0x10] sm:$0xff]  ;;  %s463_s20 = sadd.s32 1, %s997_s20   ;;  %s997_s20 = sphi %s995_s20, %s463_s20  }
 0x132   : >> { %474 = vst [vmem:[%s397_s4 + $0x10] sm:$0xff] %v473_v22  ;;  %p462_p5 = scmp.ge.s32.totalorder %s463_s20, 1 }
 0x133   : >> { %v469_v20 = vld [vmem:[%s239_s21] sm:$0xff] }
 0x134   : >> { %470 = vst [vmem:[%s397_s4] sm:$0xff] %v469_v20  ;;  %465 = sbr.rel (!%p462_p5) target bundleno = 305 (0x131), region = 141 }
 0x137   : >> { %v471_v21 = vld [vmem:[%s239_s21 + $0x8] sm:$0xff] }
 0x138   : >> { %472 = vst [vmem:[%s397_s4 + $0x8] sm:$0xff] %v471_v21 }
 0x139 PF: > { %s17_s17 = sadd.s32 1, %s993_s17   ;;  %s1194_s18 = smov %s1201_s12 }
 0x13a   : > { %p14_p6 = scmp.ge.s32.totalorder %s17_s17, 4   ;;  %s1195_s12 = smov %s977_s13 }
 0x13b   : > { %s1196_s13 = smov %s981_s14  ;;  %s1197_s14 = smov %s1124_s27 }
 0x13c   : > { %s1198_s15 = smov %s989_s16  ;;  %s1199_s16 = smov %s1194_s18 }
 0x13d   :  { %16 = sbr.rel (!%p14_p6) target bundleno = 5 (0x5), region = 163 }
 0x142   :  { %522 = vsyncpa [#allocation3], 1 }
 0x143   :  { %524 = vsyncpa [#allocation3 + $0x1], 1 }
 0x144   :  { %525 = vsyncpa [#allocation5], 1 }

</bundles_post_ra>
